<compile_context>
chip_gen: v5e
topology: v5e:2x2
jax: 0.10.0
libtpu: 0.0.40
codegen_flags: <defaults>
</compile_context>

<pallas_src>
import jax
import jax.numpy as jnp
from jax.experimental import pallas as pl
from jax.experimental.pallas import tpu as pltpu


def _round_up(a, m):
    return (a + m - 1) // m * m


def _vmem_capacity_bytes():
    """Per-TensorCore VMEM capacity; conservative 64 MiB (v7x) fallback."""
    try:
        info = pltpu.get_tpu_info()
        for name in ("vmem_capacity_bytes", "vmem_bytes", "vmem_size_bytes"):
            cap = getattr(info, name, None)
            if cap:
                return int(cap)
    except Exception:
        pass
    return 64 * 1024 * 1024


def _pad_cast_2d(a, rows, cols, dtype):
    """Cast + zero-pad to (rows, cols); no copy when already aligned/typed."""
    if a.dtype != dtype:
        a = a.astype(dtype)
    if a.shape == (rows, cols):
        return a
    return jnp.zeros((rows, cols), dtype).at[: a.shape[0], : a.shape[1]].set(a)


# ----------------------------------------------------------------------------
# Kernels
# ----------------------------------------------------------------------------
def _mlp_kernel_resident(x_ref, w1_ref, b1_ref, w2_ref, b2_ref, o_ref):
    # Whole hidden dim in one step (weights VMEM-resident): no accumulator.
    h = jnp.dot(x_ref[...], w1_ref[...], preferred_element_type=jnp.float32)
    h = jnp.maximum(h + b1_ref[...], 0.0)                       # b1 is f32
    acc = jnp.dot(h.astype(w2_ref.dtype), w2_ref[...],
                  preferred_element_type=jnp.float32)
    o_ref[...] = (acc + b2_ref[...]).astype(o_ref.dtype)


def _mlp_kernel_chunked(x_ref, w1_ref, b1_ref, w2_ref, b2_ref, o_ref, acc_ref):
    # Grid: (batch tiles [parallel], hidden-dim chunks [arbitrary, reduction]).
    k = pl.program_id(1)

    @pl.when(k == 0)
    def _():
        acc_ref[...] = jnp.zeros_like(acc_ref)

    h = jnp.dot(x_ref[...], w1_ref[...], preferred_element_type=jnp.float32)
    h = jnp.maximum(h + b1_ref[...], 0.0)
    acc_ref[...] += jnp.dot(h.astype(w2_ref.dtype), w2_ref[...],
                            preferred_element_type=jnp.float32)

    @pl.when(k == pl.num_programs(1) - 1)
    def _():
        o_ref[...] = (acc_ref[...] + b2_ref[...]).astype(o_ref.dtype)


# ----------------------------------------------------------------------------
# Tile selection
# ----------------------------------------------------------------------------
def _choose_tiles(B, K_pad, H_pad, N_pad, in_item, w_item, out_item, sub,
                  vmem_cap, tm, tk):
    """Pick (tm, tk, vmem_est). tk == H_pad means fully VMEM-resident weights."""
    budget = int(vmem_cap * 0.70)  # headroom for Mosaic internal scratch

    def est(tm_, tk_):
        # Double-buffered input/output blocks + f32 accumulator scratch.
        return (2 * tm_ * K_pad * in_item               # x tile
                + 2 * K_pad * tk_ * w_item              # W1 chunk
                + 2 * tk_ * N_pad * w_item              # W2 chunk
                + 2 * 8 * tk_ * 4 + 2 * 8 * N_pad * 4   # b1 / b2 (sublane-padded, f32)
                + 2 * tm_ * N_pad * out_item            # output tile
                + 4 * tm_ * N_pad)                      # f32 acc scratch

    user_tm = tm is not None
    if tm is None:
        b_sub = _round_up(B, sub)
        # Keep >=2 batch tiles when possible so the "parallel" grid axis can
        # shard across v7x's two TensorCores (neutral on v5e/v6e: 1 TC).
        tm = min(256, _round_up(b_sub // 2, sub)) if b_sub >= 2 * sub else b_sub

    def pick_tk(tm_):
        if tk is not None:
            t = max(128, min(_round_up(tk, 128), H_pad))
        elif est(tm_, H_pad) <= budget:
            t = H_pad                                  # resident weights
        else:
            slope = 2 * (K_pad + N_pad) * w_item + 2 * 8 * 4
            base = est(tm_, 0)
            t = (budget - base) // slope if budget > base else 0
            t = max(128, min(H_pad, (t // 128) * 128))
        while H_pad % t:                               # exact tiling of H_pad
            t -= 128
        return t

    # D_in-aware shrink: for very large D_in the x tile + W1 chunk can bust
    # v7x's 64 MiB even at tk=128; halve tm (down to the sublane multiple).
    while True:
        tk_sel = pick_tk(tm)
        if est(tm, tk_sel) <= budget or tm <= sub or user_tm:
            break
        tm = max(sub, _round_up(tm // 2, sub))
    # TODO(synk): for extreme D_in where even (sub, K_pad) + (K_pad, 128) busts
    # VMEM, add an inner D_in sub-loop (emit_pipeline) before the ReLU.
    return tm, tk_sel, est(tm, tk_sel)


# ----------------------------------------------------------------------------
# Wrapper
# ----------------------------------------------------------------------------
def make_projection_head(w1, b1, w2, b2, *, mxu_dtype=None, out_dtype=None,
                         tm=None, tk=None):
    """Pads/casts the weights ONCE (hoisted out of the per-call path) and
    returns fn(x) -> relu(x @ w1 + b1) @ w2 + b2 of shape (B, D_out)."""
    D_in, D_hid = w1.shape
    D_hid2, D_out = w2.shape
    assert D_hid2 == D_hid, "w2 must be (D_hid, D_out)"

    w_dtype = jnp.dtype(mxu_dtype) if mxu_dtype is not None else jnp.dtype(w1.dtype)
    w_item = w_dtype.itemsize
    sub = max(8, 32 // max(1, w_item))   # sublane packing: 8 f32 / 16 bf16 / 32 int8

    K_pad = _round_up(D_in, 128)
    H_pad = _round_up(D_hid, 128)
    N_pad = _round_up(D_out, 128)

    # Hoisted weight prep: zero-pad to lane-dense multiples of 128, cast to the
    # MXU dtype; already-aligned tensors are passed through without a copy.
    # Padded hidden cols give relu(0 + 0) = 0 and padded W2 rows are 0 -> exact.
    w1p = _pad_cast_2d(w1, K_pad, H_pad, w_dtype)
    w2p = _pad_cast_2d(w2, H_pad, N_pad, w_dtype)
    b1p = _pad_cast_2d(b1.reshape(1, -1), 1, H_pad, jnp.float32)
    b2p = _pad_cast_2d(b2.reshape(1, -1), 1, N_pad, jnp.float32)

    vmem_cap = _vmem_capacity_bytes()

    def apply(x):
        B, d_in = x.shape
        if d_in != D_in:
            raise ValueError(f"expected x feature dim {D_in}, got {d_in}")
        o_dtype = jnp.dtype(out_dtype) if out_dtype is not None else jnp.dtype(x.dtype)
        in_item = w_item                      # x is cast to the MXU dtype
        out_item = o_dtype.itemsize

        tm_, tk_, vmem_est = _choose_tiles(
            B, K_pad, H_pad, N_pad, in_item, w_item, out_item, sub,
            vmem_cap, tm, tk)

        B_pad = _round_up(B, tm_)
        xp = _pad_cast_2d(x, B_pad, K_pad, w_dtype)

        n_bt = B_pad // tm_
        grid_k = H_pad // tk_
        grid = (n_bt, grid_k)

        in_specs = [
            pl.BlockSpec((tm_, K_pad), lambda i, k: (i, 0)),   # x tile (resident over k)
            pl.BlockSpec((K_pad, tk_), lambda i, k: (0, k)),   # W1 chunk
            pl.BlockSpec((1, tk_), lambda i, k: (0, k)),       # b1 chunk (f32)
            pl.BlockSpec((tk_, N_pad), lambda i, k: (k, 0)),   # W2 chunk
            pl.BlockSpec((1, N_pad), lambda i, k: (0, 0)),     # b2 (resident, f32)
        ]
        out_spec = pl.BlockSpec((tm_, N_pad), lambda i, k: (i, 0))

        if grid_k == 1:
            kernel, scratch = _mlp_kernel_resident, ()
        else:
            kernel = _mlp_kernel_chunked
            scratch = (pltpu.VMEM((tm_, N_pad), jnp.float32),)

        # Always set: >= generation default, >= the actual per-step need,
        # never capped below what the tiles require, never above capacity.
        vmem_limit = min(int(vmem_cap), max(32 * 1024 * 1024, int(vmem_est * 1.25)))

        # Advisory cost model reflecting the *actual* DMA traffic of this grid:
        # with grid_k == 1 (or a single batch tile) weights are fetched once,
        # otherwise they are re-streamed once per batch tile.
        w_reads = 1 if (grid_k == 1 or n_bt == 1) else n_bt
        cost = pl.CostEstimate(
            flops=2 * B_pad * K_pad * H_pad + 2 * B_pad * H_pad * N_pad,
            transcendentals=0,
            bytes_accessed=int(
                B_pad * K_pad * in_item
                + w_reads * ((K_pad * H_pad + H_pad * N_pad) * w_item
                             + (H_pad + N_pad) * 4)
                + B_pad * N_pad * out_item),
        )

        out_padded = pl.pallas_call(
            kernel,
            out_shape=jax.ShapeDtypeStruct((B_pad, N_pad), o_dtype),
            grid_spec=pltpu.PrefetchScalarGridSpec(
                num_scalar_prefetch=0,
                grid=grid,
                in_specs=in_specs,
                out_specs=out_spec,
                scratch_shapes=scratch,
            ),
            compiler_params=pltpu.CompilerParams(
                dimension_semantics=("parallel", "arbitrary"),
                vmem_limit_bytes=vmem_limit,
            ),
            cost_estimate=cost,
        )(xp, w1p, b1p, w2p, b2p)

        return out_padded[:B, :D_out]

    return apply


def projection_head(x, w1, b1, w2, b2, **kwargs):
    """Convenience wrapper (pads weights per call; prefer make_projection_head
    when the weights are reused across calls)."""
    return make_projection_head(w1, b1, w2, b2, **kwargs)(x)


def init_params(key, input_dim, output_dim, dtype=jnp.float32):
    """Deterministic init mimicking PyTorch nn.Linear default (uniform +-1/sqrt(fan_in)).
    Weights returned already transposed to (in, out) layout for the kernel."""
    k1, k2, k3, k4 = jax.random.split(key, 4)
    bound1 = 1.0 / jnp.sqrt(input_dim)
    w1 = jax.random.uniform(k1, (input_dim, input_dim), dtype, -bound1, bound1)
    b1 = jax.random.uniform(k2, (input_dim,), dtype, -bound1, bound1)
    bound2 = 1.0 / jnp.sqrt(input_dim)
    w2 = jax.random.uniform(k3, (input_dim, output_dim), dtype, -bound2, bound2)
    b2 = jax.random.uniform(k4, (output_dim,), dtype, -bound2, bound2)
    return w1, b1, w2, b2


if __name__ == "__main__":
    key = jax.random.PRNGKey(0)
    kx, kp = jax.random.split(key)

    batch, input_dim, output_dim = 8, 32, 16
    x = jax.random.normal(kx, (batch, input_dim), dtype=jnp.float32)
    w1, b1, w2, b2 = init_params(kp, input_dim, output_dim)

    # Plain-JAX reference.
    ref = jnp.maximum(x @ w1 + b1, 0.0) @ w2 + b2

    # f32 path; weights padded once (hoisted) in the factory.
    head = make_projection_head(w1, b1, w2, b2)
    out = jax.block_until_ready(head(x))
    assert out.shape == (batch, output_dim)
    assert jnp.allclose(out, ref, atol=1e-5, rtol=1e-5)

    # bf16 MXU path (f32 accumulation) — bf16-level tolerance.
    head_bf16 = make_projection_head(w1, b1, w2, b2, mxu_dtype=jnp.bfloat16)
    out_bf16 = jax.block_until_ready(head_bf16(x))
    assert out_bf16.shape == (batch, output_dim)
    assert jnp.allclose(out_bf16, ref, atol=5e-2, rtol=5e-2)

    print("KERNEL_OK")
</pallas_src>

<mosaic_0001>
module attributes {stable_mosaic.version = 11 : i64} {
  func.func @_mlp_kernel_resident(%arg0: i32, %arg1: i32, %arg2: memref<8x128xf32, #tpu.memory_space<vmem>>, %arg3: memref<128x128xf32, #tpu.memory_space<vmem>>, %arg4: memref<1x128xf32, #tpu.memory_space<vmem>>, %arg5: memref<128x128xf32, #tpu.memory_space<vmem>>, %arg6: memref<1x128xf32, #tpu.memory_space<vmem>>, %arg7: memref<8x128xf32, #tpu.memory_space<vmem>>) attributes {dimension_semantics = [#tpu.dimension_semantics<parallel>, #tpu.dimension_semantics<arbitrary>], iteration_bounds = array<i64: 1, 1>, scalar_prefetch = 0 : i64, scratch_operands = 0 : i64, tpu.core_type = #tpu.core_type<tc>, window_params = [{transform_indices = @transform_0, window_bounds = array<i64: 8, 128>}, {transform_indices = @transform_1, window_bounds = array<i64: 128, 128>}, {transform_indices = @transform_2, window_bounds = array<i64: 1, 128>}, {transform_indices = @transform_3, window_bounds = array<i64: 128, 128>}, {pipeline_mode = #tpu.pipeline_mode<synchronous>, transform_indices = @transform_4, window_bounds = array<i64: 1, 128>}, {transform_indices = @transform_5, window_bounds = array<i64: 8, 128>}]} {
    %c0 = arith.constant 0 : index
    %c0_0 = arith.constant 0 : index
    %0 = vector.load %arg2[%c0, %c0_0] : memref<8x128xf32, #tpu.memory_space<vmem>>, vector<8x128xf32>
    %c0_1 = arith.constant 0 : index
    %c0_2 = arith.constant 0 : index
    %1 = vector.load %arg3[%c0_1, %c0_2] : memref<128x128xf32, #tpu.memory_space<vmem>>, vector<128x128xf32>
    %cst = arith.constant dense<0.000000e+00> : vector<8x128xf32>
    %2 = tpu.matmul %0, %1, %cst {dimension_numbers = #tpu.dot_dimension_numbers<[1], [0], [0], [1], [0, 0, 1, 1], [], []>} : vector<8x128xf32>, vector<128x128xf32>, vector<8x128xf32> -> vector<8x128xf32>
    %c0_3 = arith.constant 0 : index
    %c0_4 = arith.constant 0 : index
    %3 = vector.load %arg4[%c0_3, %c0_4] : memref<1x128xf32, #tpu.memory_space<vmem>>, vector<1x128xf32>
    %4 = vector.broadcast %3 : vector<1x128xf32> to vector<8x128xf32>
    %5 = arith.addf %2, %4 : vector<8x128xf32>
    %cst_5 = arith.constant 0.000000e+00 : f32
    %6 = vector.broadcast %cst_5 : f32 to vector<8x128xf32>
    %7 = arith.maximumf %5, %6 : vector<8x128xf32>
    %c0_6 = arith.constant 0 : index
    %c0_7 = arith.constant 0 : index
    %8 = vector.load %arg5[%c0_6, %c0_7] : memref<128x128xf32, #tpu.memory_space<vmem>>, vector<128x128xf32>
    %cst_8 = arith.constant dense<0.000000e+00> : vector<8x128xf32>
    %9 = tpu.matmul %7, %8, %cst_8 {dimension_numbers = #tpu.dot_dimension_numbers<[1], [0], [0], [1], [0, 0, 1, 1], [], []>} : vector<8x128xf32>, vector<128x128xf32>, vector<8x128xf32> -> vector<8x128xf32>
    %c0_9 = arith.constant 0 : index
    %c0_10 = arith.constant 0 : index
    %10 = vector.load %arg6[%c0_9, %c0_10] : memref<1x128xf32, #tpu.memory_space<vmem>>, vector<1x128xf32>
    %11 = vector.broadcast %10 : vector<1x128xf32> to vector<8x128xf32>
    %12 = arith.addf %9, %11 : vector<8x128xf32>
    %c0_11 = arith.constant 0 : index
    %c0_12 = arith.constant 0 : index
    %13 = vector.load %arg7[%c0_11, %c0_12] : memref<8x128xf32, #tpu.memory_space<vmem>>, vector<8x128xf32>
    tpu.vector_store %arg7[%c0_11, %c0_12], %12 {strides = array<i32>} : memref<8x128xf32, #tpu.memory_space<vmem>>, vector<8x128xf32>,
    return
  }
  func.func @transform_0(%arg0: i32, %arg1: i32) -> (i32, i32) {
    %c0_i32 = arith.constant 0 : i32
    %c0_i32_0 = arith.constant 0 : i32
    return %arg0, %c0_i32 : i32, i32
  }
  func.func @transform_1(%arg0: i32, %arg1: i32) -> (i32, i32) {
    %c0_i32 = arith.constant 0 : i32
    %c0_i32_0 = arith.constant 0 : i32
    return %c0_i32, %arg1 : i32, i32
  }
  func.func @transform_2(%arg0: i32, %arg1: i32) -> (i32, i32) {
    %c0_i32 = arith.constant 0 : i32
    %c0_i32_0 = arith.constant 0 : i32
    return %c0_i32, %arg1 : i32, i32
  }
  func.func @transform_3(%arg0: i32, %arg1: i32) -> (i32, i32) {
    %c0_i32 = arith.constant 0 : i32
    %c0_i32_0 = arith.constant 0 : i32
    return %arg1, %c0_i32 : i32, i32
  }
  func.func @transform_4(%arg0: i32, %arg1: i32) -> (i32, i32) {
    %c0_i32 = arith.constant 0 : i32
    %c0_i32_0 = arith.constant 0 : i32
    %c0_i32_1 = arith.constant 0 : i32
    return %c0_i32, %c0_i32_0 : i32, i32
  }
  func.func @transform_5(%arg0: i32, %arg1: i32) -> (i32, i32) {
    %c0_i32 = arith.constant 0 : i32
    %c0_i32_0 = arith.constant 0 : i32
    return %arg0, %c0_i32 : i32, i32
  }
}

</mosaic_0001>

<bundles_post_ra>
// kernel: tpu_custom_call.1
= control target key start
LH: loop header
LB: loop body
LE: loop exit
PB: predicated region body
PF: predicated region fallthrough
CT: control target
= control target key end

     0   :  { %10 = vsyncpa [#allocation3], 0  ;;  %s331_s0 = inlined_call_operand.hbm [shape: f32[8,128], index: 0, kind: input, shape index: {}]   ;;  %s332_s1 = inlined_call_operand.hbm [shape: f32[128,128], index: 1, kind: input, shape index: {}]   ;;  %s333_s2 = inlined_call_operand.vmem [shape: f32[1,128], index: 2, kind: input, shape index: {}]   ;;  %s334_s3 = inlined_call_operand.hbm [shape: f32[128,128], index: 3, kind: input, shape index: {}]   ;;  %s335_s4 = inlined_call_operand.vmem [shape: f32[1,128], index: 4, kind: input, shape index: {}]   ;;  %s336_s5 = inlined_call_operand.hbm [shape: f32[8,128], index: 5, kind: output, shape index: {}]  }
   0x1   :  { %11 = vsyncpa [#allocation6], 0  ;;  %s28_s20 = sshll.u32 %s332_s1, 4  ;;  %s29_s20 = int_to_ptr.hbm [resolvable:$true] %s28_s20 }
   0x2   :  { %12 = vsyncpa [#allocation4], 0  ;;  %s277_s21 = smov [#allocation5]   ;;  %s18_s25 = sshll.u32 %s331_s0, 4  ;;  %s19_s25 = int_to_ptr.hbm [resolvable:$true] %s18_s25 }
   0x3   :  { %s30_s22 = sshll.u32 %s277_s21, 4  ;;  %s278_s26 = smov 128   ;;  %s31_s22 = int_to_ptr.vmem [resolvable:$true] %s30_s22 }
   0x4   :  { %s279_s27 = smov 8   ;;  %s280_s28 = smov [#allocation2]  }
   0x5   :  { %36 = dma.hbm_to_vmem [thread:$0]  %s29_s20, 2048, %s31_s22, [#allocation6], %s278_s26, %s278_s26, %s279_s27  }
   0x6   :  { %s20_s29 = sshll.u32 %s280_s28, 4  ;;  %s43_s7 = sshll.u32 %s334_s3, 4  ;;  %s21_s29 = int_to_ptr.vmem [resolvable:$true] %s20_s29  ;;  %s44_s7 = int_to_ptr.hbm [resolvable:$true] %s43_s7 }
   0x7   :  { %23 = dma.hbm_to_vmem [thread:$0]  %s19_s25, 128, %s21_s29, [#allocation3]  }
   0x8   :  { %s281_s1 = smov [#allocation7]  }
   0x9   :  { %s45_s8 = sshll.u32 %s281_s1, 4  ;;  %s46_s8 = int_to_ptr.vmem [resolvable:$true] %s45_s8 }
   0xa   :  { %51 = dma.hbm_to_vmem [thread:$0]  %s44_s7, 2048, %s46_s8, [#allocation6], %s278_s26, %s278_s26, %s279_s27  }
   0xb   :  { %271 = dma.done.wait [#allocation3], 128  }
   0xc   :  { %272 = vsyncadd [#allocation3], 4294967168 }
   0xd   :  { %273 = dma.done.wait [#allocation6], 4096  }
   0xe   :  { %274 = vsyncadd [#allocation6], 4294963200  ;;  %v82_v0 = vld [vmem:[#allocation5 + $0x78] sm:$0xff]  ;;  %v81_v1 = vld [vmem:[#allocation5 + $0x70] sm:$0xff]  ;;  %s282_s11 = smov [#allocation8]   ;;  %s156_s15 = sshll.u32 %s336_s5, 4  ;;  %s157_s15 = int_to_ptr.hbm [resolvable:$true] %s156_s15 }
   0xf   :  { %87 = vmatpush.msra.mxu0 %v82_v0  ;;  %v80_v2 = vld [vmem:[#allocation5 + $0x68] sm:$0xff]  ;;  %v79_v3 = vld [vmem:[#allocation5 + $0x60] sm:$0xff]  ;;  %v123_v4 = vld [vmem:[#allocation7 + $0x78] sm:$0xff]  ;;  %s154_s12 = sshll.u32 %s282_s11, 4  ;;  %s155_s12 = int_to_ptr.vmem [resolvable:$true] %s154_s12 }
  0x10   :  { %v78_v5 = vld [vmem:[#allocation5 + $0x58] sm:$0xff]  ;;  %128 = vmatpush.msra.mxu1 %v123_v4  ;;  %v122_v6 = vld [vmem:[#allocation7 + $0x70] sm:$0xff]  ;;  %v121_v7 = vld [vmem:[#allocation7 + $0x68] sm:$0xff] }
  0x11   :  { %88 = vmatpush.msra.mxu0 %v81_v1  ;;  %v77_v8 = vld [vmem:[#allocation5 + $0x50] sm:$0xff]  ;;  %v120_v9 = vld [vmem:[#allocation7 + $0x60] sm:$0xff]  ;;  %v76_v10 = vld [vmem:[#allocation5 + $0x48] sm:$0xff] }
  0x12   :  { %129 = vmatpush.msra.mxu1 %v122_v6  ;;  %v119_v11 = vld [vmem:[#allocation7 + $0x58] sm:$0xff]  ;;  %v75_v12 = vld [vmem:[#allocation5 + $0x40] sm:$0xff]  ;;  %v118_v13 = vld [vmem:[#allocation7 + $0x50] sm:$0xff] }
  0x13   :  { %89 = vmatpush.msra.mxu0 %v80_v2  ;;  %v74_v14 = vld [vmem:[#allocation5 + $0x38] sm:$0xff]  ;;  %v117_v15 = vld [vmem:[#allocation7 + $0x48] sm:$0xff]  ;;  %v73_v16 = vld [vmem:[#allocation5 + $0x30] sm:$0xff] }
  0x14   :  { %130 = vmatpush.msra.mxu1 %v121_v7  ;;  %v116_v17 = vld [vmem:[#allocation7 + $0x40] sm:$0xff]  ;;  %v72_v18 = vld [vmem:[#allocation5 + $0x28] sm:$0xff]  ;;  %v115_v19 = vld [vmem:[#allocation7 + $0x38] sm:$0xff] }
  0x15   :  { %90 = vmatpush.msra.mxu0 %v79_v3  ;;  %v71_v20 = vld [vmem:[#allocation5 + $0x20] sm:$0xff]  ;;  %v114_v21 = vld [vmem:[#allocation7 + $0x30] sm:$0xff]  ;;  %v70_v22 = vld [vmem:[#allocation5 + $0x18] sm:$0xff] }
  0x16   :  { %131 = vmatpush.msra.mxu1 %v120_v9  ;;  %v113_v23 = vld [vmem:[#allocation7 + $0x28] sm:$0xff]  ;;  %v69_v24 = vld [vmem:[#allocation5 + $0x10] sm:$0xff]  ;;  %v112_v25 = vld [vmem:[#allocation7 + $0x20] sm:$0xff] }
  0x17   :  { %91 = vmatpush.msra.mxu0 %v78_v5  ;;  %v68_v26 = vld [vmem:[#allocation5 + $0x8] sm:$0xff]  ;;  %v111_v27 = vld [vmem:[#allocation7 + $0x18] sm:$0xff]  ;;  %v67_v28 = vld [vmem:[#allocation5] sm:$0xff] }
  0x18   :  { %132 = vmatpush.msra.mxu1 %v119_v11  ;;  %v66_v29 = vld [vmem:[#allocation2] sm:$0xff]  ;;  %v110_v30 = vld [vmem:[#allocation7 + $0x10] sm:$0xff]  ;;  %v109_v31 = vld [vmem:[#allocation7 + $0x8] sm:$0xff] }
  0x19   :  { %92 = vmatpush.msra.mxu0 %v77_v8  ;;  %v108_v32 = vld [vmem:[#allocation7] sm:$0xff]  ;;  %v173_v33 = vld [vmem:[%s333_s2] ss:$0 sm:$0xff] }
  0x1a   :  { %133 = vmatpush.msra.mxu1 %v118_v13  ;;  %v174_v37 = vld [vmem:[%s335_s4] ss:$0 sm:$0xff] }
  0x1b   :  { %93 = vmatpush.msra.mxu0 %v76_v10 }
  0x1c   :  { %134 = vmatpush.msra.mxu1 %v117_v15 }
  0x1d   :  { %94 = vmatpush.msra.mxu0 %v75_v12 }
  0x1e   :  { %135 = vmatpush.msra.mxu1 %v116_v17 }
  0x1f   :  { %95 = vmatpush.msra.mxu0 %v74_v14 }
  0x20   :  { %136 = vmatpush.msra.mxu1 %v115_v19 }
  0x21   :  { %96 = vmatpush.msra.mxu0 %v73_v16 }
  0x22   :  { %137 = vmatpush.msra.mxu1 %v114_v21 }
  0x23   :  { %97 = vmatpush.msra.mxu0 %v72_v18 }
  0x24   :  { %138 = vmatpush.msra.mxu1 %v113_v23 }
  0x25   :  { %98 = vmatpush.msra.mxu0 %v71_v20 }
  0x26   :  { %139 = vmatpush.msra.mxu1 %v112_v25 }
  0x27   :  { %99 = vmatpush.msra.mxu0 %v70_v22 }
  0x28   :  { %140 = vmatpush.msra.mxu1 %v111_v27 }
  0x29   :  { %100 = vmatpush.msra.mxu0 %v69_v24 }
  0x2a   :  { %141 = vmatpush.msra.mxu1 %v110_v30 }
  0x2b   :  { %101 = vmatpush.msra.mxu0 %v68_v26 }
  0x2c   :  { %142 = vmatpush.msra.mxu1 %v109_v31 }
  0x2d   :  { %102 = vmatpush.msra.mxu0 %v67_v28 }
  0x2e   :  { %103 = vmatmul.f32.vlgmr.msra.gmra.mxu0 %v66_v29  ;;  %143 = vmatpush.msra.mxu1 %v108_v32 }
  0xab   :  { %v104_v34 = vpop.f32.mrf.mxu0 }
  0xac   :  { %v105_v35 = vadd.f32 %v173_v33, %v104_v34 }
  0xae   :  { %v107_v36 = vmax.f32 %v105_v35, 0.0 }
  0xb0   :  { %144 = vmatmul.f32.vlgmr.msra.gmra.mxu1 %v107_v36 }
 0x12d   :  { %v145_v38 = vpop.f32.mrf.mxu1 }
 0x12e   :  { %v146_v39 = vadd.f32 %v174_v37, %v145_v38 }
 0x130   :  { %148 = vst [vmem:[#allocation8] sm:$0xff] %v146_v39 }
 0x131   :  { %159 = dma.vmem_to_hbm [thread:$0]  %s155_s12, 128, %s157_s15, [#allocation4]  }
 0x132   :  { %275 = dma.done.wait [#allocation4], 128  }
 0x133   :  { %276 = vsyncadd [#allocation4], 4294967168 }
 0x134   :  { %164 = vsyncpa [#allocation3], 1 }
 0x135   :  { %165 = vsyncpa [#allocation6], 1 }
 0x136   :  { %166 = vsyncpa [#allocation4], 1 }

</bundles_post_ra>
